<compile_context>
chip_gen: v7x
topology: tpu7x:2x2x1
jax: 0.10.0
libtpu: 0.0.40
codegen_flags: <defaults>
</compile_context>

<pallas_src>
import functools

import jax
import jax.numpy as jnp
from jax.experimental import pallas as pl
from jax.experimental.pallas import tpu as pltpu


def gcn_prelu_kernel(a_ref, xw_ref, b_ref, alpha_ref, o_ref):
    """K-tiled aggregation with fused bias/PReLU epilogue, accumulating in o_ref.

    a_ref:     [TN, TK]  bf16 normalized-adjacency tile (rows i, cols k)
    xw_ref:    [TK, Dp]  bf16 precomputed X @ W tile (rows k)
    b_ref:     [1,  Dp]  f32 GCN bias
    alpha_ref: [1,  Dp]  f32 PReLU per-channel slope
    o_ref:     [TN, Dp]  f32 output tile (resident across k; doubles as accumulator)
    """
    k = pl.program_id(1)

    @pl.when(k == 0)
    def _():
        o_ref[...] = jnp.zeros_like(o_ref)

    # MXU: bf16 operands, f32 accumulation, directly into the resident output tile.
    o_ref[...] += jnp.dot(a_ref[...], xw_ref[...],
                          preferred_element_type=jnp.float32)

    # Epilogue once per output tile (VPU work kept out of the inner k loop).
    @pl.when(k == pl.num_programs(1) - 1)
    def _():
        h = o_ref[...] + b_ref[...]
        o_ref[...] = jnp.where(h > 0, h, alpha_ref[...] * h)


def build_normalized_adjacency(edge_index, num_nodes):
    """Glue: edge_index [2, E] -> dense D^-1/2 (A + I) D^-1/2, float32 [N, N]."""
    src, dst = edge_index[0], edge_index[1]
    loops = jnp.arange(num_nodes, dtype=src.dtype)
    src = jnp.concatenate([src, loops])
    dst = jnp.concatenate([dst, loops])
    adj = jnp.zeros((num_nodes, num_nodes), jnp.float32).at[dst, src].add(1.0)
    deg = adj.sum(axis=1)
    dinv = jnp.where(deg > 0, jax.lax.rsqrt(deg), 0.0)
    return adj * dinv[:, None] * dinv[None, :]


def _round_up(v, m):
    return ((v + m - 1) // m) * m


@functools.partial(jax.jit, static_argnames=("tile_n", "tile_k"))
def encoder_forward(x, a_norm, w, b, alpha, *, tile_n=256, tile_k=256):
    n, _ = x.shape
    d = w.shape[1]

    # 1) Feature transform once (grid-invariant) as a plain XLA dot.
    xw = jnp.dot(x, w, preferred_element_type=jnp.float32)

    # 2) Pad: lane dim D up to a multiple of 128 (lane-dense stores / full MXU output
    #    tile).  Rows of A pad to tile_n, reduction (columns of A == rows of XW) pads
    #    to tile_k — independently, so no lcm blow-up.
    d_pad = _round_up(max(d, 128), 128)
    n_row_pad = _round_up(n, tile_n)
    n_col_pad = _round_up(n, tile_k)

    xw_p = jnp.zeros((n_col_pad, d_pad), jnp.bfloat16).at[:n, :d].set(
        xw.astype(jnp.bfloat16))
    a_p = jnp.zeros((n_row_pad, n_col_pad), jnp.bfloat16).at[:n, :n].set(
        a_norm.astype(jnp.bfloat16))
    b_p = jnp.zeros((1, d_pad), jnp.float32).at[:, :d].set(b)
    alpha_p = jnp.zeros((1, d_pad), jnp.float32).at[:, :d].set(alpha)

    grid = (n_row_pad // tile_n, n_col_pad // tile_k)   # reduction axis last

    out = pl.pallas_call(
        gcn_prelu_kernel,
        out_shape=jax.ShapeDtypeStruct((n_row_pad, d_pad), jnp.float32),
        grid=grid,
        in_specs=[
            pl.BlockSpec((tile_n, tile_k), lambda i, k: (i, k)),   # A_norm tile
            pl.BlockSpec((tile_k, d_pad), lambda i, k: (k, 0)),    # XW tile
            pl.BlockSpec((1, d_pad), lambda i, k: (0, 0)),         # bias
            pl.BlockSpec((1, d_pad), lambda i, k: (0, 0)),         # PReLU alpha
        ],
        out_specs=pl.BlockSpec((tile_n, d_pad), lambda i, k: (i, 0)),
        compiler_params=pltpu.CompilerParams(
            dimension_semantics=("parallel", "arbitrary")),
    )(a_p, xw_p, b_p, alpha_p)

    # Slice off node/lane padding.
    return out[:n, :d]


if __name__ == "__main__":
    # Small shapes consistent with the module: N nodes, F input features, D hidden.
    N, F_IN, HIDDEN = 300, 48, 64            # HIDDEN < 128 exercises the lane padding
    TILE_N, TILE_K = 128, 128                # -> row/col pad = 384, grid = (3, 3)

    key = jax.random.PRNGKey(0)
    kx, kw = jax.random.split(key, 2)

    # Node features
    x = jax.random.normal(kx, (N, F_IN), jnp.float32)

    # Deterministic synthetic edge_index [2, E]: a ring graph (both directions)
    src = jnp.arange(N, dtype=jnp.int32)
    dst = (src + 1) % N
    edge_index = jnp.stack([jnp.concatenate([src, dst]),
                            jnp.concatenate([dst, src])], axis=0)

    # Parameters (deterministic init, matching module shapes)
    w = jax.random.normal(kw, (F_IN, HIDDEN), jnp.float32) * (
        1.0 / jnp.sqrt(jnp.float32(F_IN)))
    b = jnp.zeros((1, HIDDEN), jnp.float32)
    # nn.PReLU(hidden_dim): per-channel slope, PyTorch default init = 0.25
    alpha = jnp.full((1, HIDDEN), 0.25, jnp.float32)

    # TODO(synk): corrupt=True path (torch.randperm row shuffle) not implemented;
    # it would be a jax.random.permutation gather in glue before the kernel.

    a_norm = build_normalized_adjacency(edge_index, N)
    out = encoder_forward(x, a_norm, w, b, alpha, tile_n=TILE_N, tile_k=TILE_K)
    jax.block_until_ready(out)

    # Reference check 1: same bf16-rounded operands, f32 accumulation (tight).
    a_bf = a_norm.astype(jnp.bfloat16).astype(jnp.float32)
    xw_bf = jnp.dot(x, w).astype(jnp.bfloat16).astype(jnp.float32)
    ref_h = a_bf @ xw_bf + b
    ref = jnp.where(ref_h > 0, ref_h, alpha * ref_h)
    assert jnp.allclose(out, ref, atol=1e-4, rtol=1e-4), "mismatch vs bf16 reference"

    # Reference check 2: full f32 reference (loose, bounds bf16 operand rounding).
    ref32_h = a_norm @ (x @ w) + b
    ref32 = jnp.where(ref32_h > 0, ref32_h, alpha * ref32_h)
    assert jnp.allclose(out, ref32, atol=5e-2, rtol=5e-2), "mismatch vs f32 reference"

    print("KERNEL_OK")
</pallas_src>

<mosaic_0001>
module attributes {stable_mosaic.version = 11 : i64} {
  func.func @gcn_prelu_kernel(%arg0: i32, %arg1: i32, %arg2: memref<128x128xbf16, #tpu.memory_space<vmem>>, %arg3: memref<128x128xbf16, #tpu.memory_space<vmem>>, %arg4: memref<1x128xf32, #tpu.memory_space<vmem>>, %arg5: memref<1x128xf32, #tpu.memory_space<vmem>>, %arg6: memref<128x128xf32, #tpu.memory_space<vmem>>) attributes {dimension_semantics = [#tpu.dimension_semantics<parallel>, #tpu.dimension_semantics<arbitrary>], iteration_bounds = array<i64: 3, 3>, scalar_prefetch = 0 : i64, scratch_operands = 0 : i64, tpu.core_type = #tpu.core_type<tc>, window_params = [{transform_indices = @transform_0, window_bounds = array<i64: 128, 128>}, {transform_indices = @transform_1, window_bounds = array<i64: 128, 128>}, {pipeline_mode = #tpu.pipeline_mode<synchronous>, transform_indices = @transform_2, window_bounds = array<i64: 1, 128>}, {pipeline_mode = #tpu.pipeline_mode<synchronous>, transform_indices = @transform_3, window_bounds = array<i64: 1, 128>}, {transform_indices = @transform_4, window_bounds = array<i64: 128, 128>}]} {
    %c0_i32 = arith.constant 0 : i32
    %0 = arith.cmpi eq, %arg1, %c0_i32 : i32
    %1 = arith.extui %0 : i1 to i32
    %c0_i32_0 = arith.constant 0 : i32
    %2 = arith.cmpi ne, %1, %c0_i32_0 : i32
    scf.if %2 {
      %cst_9 = arith.constant 0.000000e+00 : f32
      %12 = vector.broadcast %cst_9 : f32 to vector<128x128xf32>
      %c0_10 = arith.constant 0 : index
      %c0_11 = arith.constant 0 : index
      %13 = vector.load %arg6[%c0_10, %c0_11] : memref<128x128xf32, #tpu.memory_space<vmem>>, vector<128x128xf32>
      tpu.vector_store %arg6[%c0_10, %c0_11], %12 {strides = array<i32>} : memref<128x128xf32, #tpu.memory_space<vmem>>, vector<128x128xf32>,
    } else {
    }
    %c0 = arith.constant 0 : index
    %c0_1 = arith.constant 0 : index
    %3 = vector.load %arg6[%c0, %c0_1] : memref<128x128xf32, #tpu.memory_space<vmem>>, vector<128x128xf32>
    %c0_2 = arith.constant 0 : index
    %c0_3 = arith.constant 0 : index
    %4 = vector.load %arg2[%c0_2, %c0_3] : memref<128x128xbf16, #tpu.memory_space<vmem>>, vector<128x128xbf16>
    %c0_4 = arith.constant 0 : index
    %c0_5 = arith.constant 0 : index
    %5 = vector.load %arg3[%c0_4, %c0_5] : memref<128x128xbf16, #tpu.memory_space<vmem>>, vector<128x128xbf16>
    %cst = arith.constant dense<0.000000e+00> : vector<128x128xf32>
    %6 = tpu.matmul %4, %5, %cst {dimension_numbers = #tpu.dot_dimension_numbers<[1], [0], [0], [1], [0, 0, 1, 1], [], []>} : vector<128x128xbf16>, vector<128x128xbf16>, vector<128x128xf32> -> vector<128x128xf32>
    %7 = arith.addf %3, %6 : vector<128x128xf32>
    %c0_6 = arith.constant 0 : index
    %c0_7 = arith.constant 0 : index
    %8 = vector.load %arg6[%c0_6, %c0_7] : memref<128x128xf32, #tpu.memory_space<vmem>>, vector<128x128xf32>
    tpu.vector_store %arg6[%c0_6, %c0_7], %7 {strides = array<i32>} : memref<128x128xf32, #tpu.memory_space<vmem>>, vector<128x128xf32>,
    %c2_i32 = arith.constant 2 : i32
    %9 = arith.cmpi eq, %arg1, %c2_i32 : i32
    %10 = arith.extui %9 : i1 to i32
    %c0_i32_8 = arith.constant 0 : i32
    %11 = arith.cmpi ne, %10, %c0_i32_8 : i32
    scf.if %11 {
      %c0_9 = arith.constant 0 : index
      %c0_10 = arith.constant 0 : index
      %12 = vector.load %arg6[%c0_9, %c0_10] : memref<128x128xf32, #tpu.memory_space<vmem>>, vector<128x128xf32>
      %c0_11 = arith.constant 0 : index
      %c0_12 = arith.constant 0 : index
      %13 = vector.load %arg4[%c0_11, %c0_12] : memref<1x128xf32, #tpu.memory_space<vmem>>, vector<1x128xf32>
      %14 = vector.broadcast %13 : vector<1x128xf32> to vector<128x128xf32>
      %15 = arith.addf %12, %14 : vector<128x128xf32>
      %cst_13 = arith.constant 0.000000e+00 : f32
      %16 = vector.broadcast %cst_13 : f32 to vector<128x128xf32>
      %17 = arith.cmpf ogt, %15, %16 : vector<128x128xf32>
      %c0_14 = arith.constant 0 : index
      %c0_15 = arith.constant 0 : index
      %18 = vector.load %arg5[%c0_14, %c0_15] : memref<1x128xf32, #tpu.memory_space<vmem>>, vector<1x128xf32>
      %19 = vector.broadcast %18 : vector<1x128xf32> to vector<128x128xf32>
      %20 = arith.mulf %19, %15 : vector<128x128xf32>
      %21 = arith.select %17, %15, %20 : vector<128x128xi1>, vector<128x128xf32>
      %c0_16 = arith.constant 0 : index
      %c0_17 = arith.constant 0 : index
      %22 = vector.load %arg6[%c0_16, %c0_17] : memref<128x128xf32, #tpu.memory_space<vmem>>, vector<128x128xf32>
      tpu.vector_store %arg6[%c0_16, %c0_17], %21 {strides = array<i32>} : memref<128x128xf32, #tpu.memory_space<vmem>>, vector<128x128xf32>,
    } else {
    }
    return
  }
  func.func @transform_0(%arg0: i32, %arg1: i32) -> (i32, i32) {
    %c0_i32 = arith.constant 0 : i32
    return %arg0, %arg1 : i32, i32
  }
  func.func @transform_1(%arg0: i32, %arg1: i32) -> (i32, i32) {
    %c0_i32 = arith.constant 0 : i32
    %c0_i32_0 = arith.constant 0 : i32
    return %arg1, %c0_i32 : i32, i32
  }
  func.func @transform_2(%arg0: i32, %arg1: i32) -> (i32, i32) {
    %c0_i32 = arith.constant 0 : i32
    %c0_i32_0 = arith.constant 0 : i32
    %c0_i32_1 = arith.constant 0 : i32
    return %c0_i32, %c0_i32_0 : i32, i32
  }
  func.func @transform_3(%arg0: i32, %arg1: i32) -> (i32, i32) {
    %c0_i32 = arith.constant 0 : i32
    %c0_i32_0 = arith.constant 0 : i32
    %c0_i32_1 = arith.constant 0 : i32
    return %c0_i32, %c0_i32_0 : i32, i32
  }
  func.func @transform_4(%arg0: i32, %arg1: i32) -> (i32, i32) {
    %c0_i32 = arith.constant 0 : i32
    %c0_i32_0 = arith.constant 0 : i32
    return %arg0, %c0_i32 : i32, i32
  }
}

</mosaic_0001>

<bundles_post_ra>
// kernel: encoder_forward.1
= control target key start
LH: loop header
LB: loop body
LE: loop exit
PB: predicated region body
PF: predicated region fallthrough
CT: control target
= control target key end

     0   :  { %s1092_s15 = smov 0   ;;  %s1094_s16 = smov 0   ;;  %s1349_s0 = inlined_call_operand.vmem [shape: bf16[384,384], index: 0, kind: input, shape index: {}]   ;;  %s1350_s1 = inlined_call_operand.vmem [shape: bf16[384,128], index: 1, kind: input, shape index: {}]   ;;  %s1351_s2 = inlined_call_operand.vmem [shape: f32[1,128], index: 2, kind: input, shape index: {}]   ;;  %s1352_s3 = inlined_call_operand.vmem [shape: f32[1,128], index: 3, kind: input, shape index: {}]   ;;  %s1353_s4 = inlined_call_operand.vmem [shape: f32[384,128], index: 4, kind: output, shape index: {}]  }
   0x1   :  { %s1096_s17 = smov 0   ;;  %s1098_s18 = smov 0  }
   0x2   :  { %s1100_s19 = smov 0   ;;  %s1102_s20 = smov 0  }
   0x3   :  { %s1104_s21 = smov 0  }
   0x4 LB: > { %s23_s22 = sadd.s32 1, %s1056_s19  ;;  %s26_s23 = sadd.s32 1, %s1060_s20  ;;  %s1064_s21 = sphi %s1104_s21, %s14_s21   ;;  %s1060_s20 = sphi %s1102_s20, %s1359_s20   ;;  %s1056_s19 = sphi %s1100_s19, %s1358_s19   ;;  %s1052_s18 = sphi %s1098_s18, %s1357_s18   ;;  %s1048_s17 = sphi %s1096_s17, %s1356_s17   ;;  %s1044_s16 = sphi %s1094_s16, %s1355_s16   ;;  %s1040_s15 = sphi %s1092_s15, %s1354_s15  }
   0x5   : > { %p24_p0 = scmp.ge.s32.totalorder %s23_s22, 3  ;;  %p42_p1 = scmp.ne.s32.totalorder %s1044_s16, %s1040_s15 }
   0x6   : > { %p43_p2 = scmp.eq.s32.totalorder %s1064_s21, 0  ;;  %s35_s27 = sadd.s32 1, %s1044_s16 }
   0x7   : > { %s1361_s22 = smov (%p24_p0, %s23_s22), 0  ;;  %s1363_s23 = smov (!%p24_p0, %s26_s23), %s1060_s20 }
   0x8   : > { %p44_p3 = por %p43_p2, %p42_p1  ;;  %p28_p4 = scmp.ge.s32.totalorder %s1363_s23, 3 }
   0x9   : > { %s31_s24 = ssub.s32 %s1056_s19, %s1361_s22  ;;  %p839_p6 = scmp.ge.s32.totalorder %s1064_s21, 9 }
   0xa   : > { %s1365_s23 = smov (%p28_p4, %s1363_s23), 0 }
   0xb   : > { %s30_s25 = ssub.s32 %s1060_s20, %s1365_s23  ;;  %168 = sbr.rel (%p839_p6) target bundleno = 35 (0x23), region = 24 }
   0xc   : > { %s32_s26 = sor.u32 %s31_s24, %s30_s25 }
   0xd   : > { %p33_p5 = scmp.eq.s32.totalorder %s32_s26, 0 }
   0xf   : > { %s1143_s28 = scalar_select %p33_p5, %s1044_s16, %s35_s27  }
  0x12   : > { %171 = sbr.rel (!%p44_p3) target bundleno = 35 (0x23), region = 28  ;;  %s173_s29 = sand.u32 (%p44_p3), 1, %s1044_s16  }
  0x13   : > { %s936_s30 = smul.u32 (%p44_p3), 48, %s1060_s20  ;;  %s840_s5 = sshll.u32 (%p44_p3), %s173_s29, 6 }
  0x14   : > { %s175_s11 = scalar_lea.vmem (%p44_p3), [#allocation2], %s840_s5 }
  0x15   : > { %s178_s6 = sadd.s32 (%p44_p3), %s1056_s19, %s936_s30 }
  0x16   : > { %s843_s7 = sshll.u32 (%p44_p3), %s178_s6, 2 }
  0x17   : > { %s1152_s10 = scalar_lea.vmem (%p44_p3), %s1349_s0, %s843_s7 }
  0x18   : > { %v196_v0 = vld [vmem:[%s1152_s10] sm:$0xf] (%p44_p3)  ;;  %v198_v1 = vld [vmem:[%s1152_s10 + $0xc] sm:$0xf] (%p44_p3)  ;;  %v200_v2 = vld [vmem:[%s1152_s10 + $0x18] sm:$0xf] (%p44_p3) }
  0x19   : > { %197 = vst [vmem:[%s175_s11] sm:$0xf] %v196_v0  ;;  %199 = vst [vmem:[%s175_s11 + $0x4] sm:$0xf] %v198_v1  ;;  %v202_v3 = vld [vmem:[%s1152_s10 + $0x24] sm:$0xf] }
  0x1a   : > { %201 = vst [vmem:[%s175_s11 + $0x8] sm:$0xf] %v200_v2  ;;  %v204_v4 = vld [vmem:[%s1152_s10 + $0x30] sm:$0xf]  ;;  %v206_v5 = vld [vmem:[%s1152_s10 + $0x3c] sm:$0xf] }
  0x1b   : > { %203 = vst [vmem:[%s175_s11 + $0xc] sm:$0xf] %v202_v3  ;;  %205 = vst [vmem:[%s175_s11 + $0x10] sm:$0xf] %v204_v4  ;;  %v208_v6 = vld [vmem:[%s1152_s10 + $0x48] sm:$0xf] }
  0x1c   : > { %207 = vst [vmem:[%s175_s11 + $0x14] sm:$0xf] %v206_v5  ;;  %v210_v7 = vld [vmem:[%s1152_s10 + $0x54] sm:$0xf]  ;;  %v212_v8 = vld [vmem:[%s1152_s10 + $0x60] sm:$0xf] }
  0x1d   : > { %209 = vst [vmem:[%s175_s11 + $0x18] sm:$0xf] %v208_v6  ;;  %211 = vst [vmem:[%s175_s11 + $0x1c] sm:$0xf] %v210_v7  ;;  %v214_v9 = vld [vmem:[%s1152_s10 + $0x6c] sm:$0xf] }
  0x1e   : > { %213 = vst [vmem:[%s175_s11 + $0x20] sm:$0xf] %v212_v8  ;;  %v216_v10 = vld [vmem:[%s1152_s10 + $0x78] sm:$0xf]  ;;  %v218_v11 = vld [vmem:[%s1152_s10 + $0x84] sm:$0xf] }
  0x1f   : > { %215 = vst [vmem:[%s175_s11 + $0x24] sm:$0xf] %v214_v9  ;;  %217 = vst [vmem:[%s175_s11 + $0x28] sm:$0xf] %v216_v10  ;;  %v220_v12 = vld [vmem:[%s1152_s10 + $0x90] sm:$0xf] }
  0x20   : > { %219 = vst [vmem:[%s175_s11 + $0x2c] sm:$0xf] %v218_v11  ;;  %v222_v13 = vld [vmem:[%s1152_s10 + $0x9c] sm:$0xf]  ;;  %v224_v14 = vld [vmem:[%s1152_s10 + $0xa8] sm:$0xf] }
  0x21   : > { %221 = vst [vmem:[%s175_s11 + $0x30] sm:$0xf] %v220_v12  ;;  %223 = vst [vmem:[%s175_s11 + $0x34] sm:$0xf] %v222_v13  ;;  %v226_v15 = vld [vmem:[%s1152_s10 + $0xb4] sm:$0xf] }
  0x22   : > { %225 = vst [vmem:[%s175_s11 + $0x38] sm:$0xf] %v224_v14  ;;  %227 = vst [vmem:[%s175_s11 + $0x3c] sm:$0xf] %v226_v15 }
  0x23 PF: > { %p844_p7 = scmp.ge.s32.totalorder %s1064_s21, 1  ;;  %p290_p8 = scmp.lt.s32.totalorder %s1064_s21, 10 }
  0x25   : > { %p291_p9 = pnand %p844_p7, %p290_p8 }
  0x26   : > { %s297_s12 = sand.u32 (!%p291_p9), 1, %s1040_s15   ;;  %s846_s13 = sshll.u32 (!%p291_p9), %s1048_s17, 4 }
  0x27   : > { %294 = sbr.rel (%p291_p9) target bundleno = 334 (0x14e), region = 73  ;;  %s845_s14 = sshll.u32 (!%p291_p9), %s297_s12, 6 }
  0x28   : > { %p329_p10 = scmp.lt.s32.totalorder (!%p291_p9), %s846_s13, 47  ;;  %s848_s24 = sshll.u32 (!%p291_p9), %s1052_s18, 4 }
  0x29   : > { %p335_p11 = scmp.lt.s32.totalorder (!%p291_p9), %s848_s24, 47  ;;  %s1185_s15 = scalar_lea.vmem (!%p291_p9), [#allocation2], %s845_s14 }
  0x2a   : > { %p850_p12 = scmp.ne.s32.totalorder (!%p291_p9), %s1048_s17, 0 }
  0x2e   : > { %s1367_s13 = smov (!%p329_p10, %s846_s13), 47  ;;  %s1369_s24 = smov (!%p335_p11, %s848_s24), 47 }
  0x2f   : > { %s847_s25 = sshll.u32 %s1367_s13, 2  ;;  %s849_s30 = sshll.u32 %s1369_s24, 3  ;;  %v1066_v16 = vmov (!%p850_p12), 0.0  }
  0x30   : > { %s1178_s29 = scalar_lea.vmem %s1350_s1, %s847_s25  ;;  %s1183_s7 = scalar_lea.vmem %s1353_s4, %s849_s30 }
  0x31   : > { %344 = sbr.rel (%p850_p12) target bundleno = 57 (0x39), region = 81  ;;  %345 = vst [vmem:[%s1183_s7] sm:$0xff] (!%p850_p12), %v1066_v16  ;;  %346 = vst [vmem:[%s1183_s7 + $0x8] sm:$0xff] (!%p850_p12), %v1066_v16 }
  0x32   : > { %347 = vst [vmem:[%s1183_s7 + $0x10] sm:$0xff] (!%p850_p12), %v1066_v16  ;;  %348 = vst [vmem:[%s1183_s7 + $0x18] sm:$0xff] (!%p850_p12), %v1066_v16 }
  0x33   : > { %349 = vst [vmem:[%s1183_s7 + $0x20] sm:$0xff] (!%p850_p12), %v1066_v16  ;;  %350 = vst [vmem:[%s1183_s7 + $0x28] sm:$0xff] (!%p850_p12), %v1066_v16 }
  0x34   : > { %351 = vst [vmem:[%s1183_s7 + $0x30] sm:$0xff] (!%p850_p12), %v1066_v16  ;;  %352 = vst [vmem:[%s1183_s7 + $0x38] sm:$0xff] (!%p850_p12), %v1066_v16 }
  0x35   : > { %353 = vst [vmem:[%s1183_s7 + $0x40] sm:$0xff] (!%p850_p12), %v1066_v16  ;;  %354 = vst [vmem:[%s1183_s7 + $0x48] sm:$0xff] (!%p850_p12), %v1066_v16 }
  0x36   : > { %355 = vst [vmem:[%s1183_s7 + $0x50] sm:$0xff] (!%p850_p12), %v1066_v16  ;;  %356 = vst [vmem:[%s1183_s7 + $0x58] sm:$0xff] (!%p850_p12), %v1066_v16 }
  0x37   : > { %357 = vst [vmem:[%s1183_s7 + $0x60] sm:$0xff] (!%p850_p12), %v1066_v16  ;;  %358 = vst [vmem:[%s1183_s7 + $0x68] sm:$0xff] (!%p850_p12), %v1066_v16 }
  0x38   : > { %359 = vst [vmem:[%s1183_s7 + $0x70] sm:$0xff] %v1066_v16  ;;  %360 = vst [vmem:[%s1183_s7 + $0x78] sm:$0xff] %v1066_v16 }
  0x39 PF: > { %v994_v17 = vld [vmem:[%s1178_s29] sm:$0xff]   ;;  %v995_v18 = vld [vmem:[%s1178_s29 + $0x8] sm:$0xff]   ;;  %v996_v19 = vld [vmem:[%s1178_s29 + $0x10] sm:$0xff]   ;;  %p867_p13 = scmp.ne.s32.totalorder %s1048_s17, 2 }
  0x3a   : > { %888 = vmatprep.subr.bf16.mxu0 %v994_v17  ;;  %920 = vmatprep.subr.bf16.mxu1 %v994_v17  ;;  %v997_v20 = vld [vmem:[%s1178_s29 + $0x18] sm:$0xff]   ;;  %v1002_v21 = vld [vmem:[%s1185_s15] sm:$0xff]   ;;  %v999_v24 = vld [vmem:[%s1178_s29 + $0x28] sm:$0xff]  }
  0x3b   : > { %889 = vmatpush3.bf16.msra.mxu0 %v994_v17  ;;  %928 = vmatpush3.bf16.msra.mxu1 %v994_v17  ;;  %v1003_v22 = vld [vmem:[%s1185_s15 + $0x20] sm:$0xff]   ;;  %v1000_v25 = vld [vmem:[%s1178_s29 + $0x30] sm:$0xff]   ;;  %v1001_v26 = vld [vmem:[%s1178_s29 + $0x38] sm:$0xff]  }
  0x3c   : > { %890 = vmatprep.subr.bf16.mxu0 %v995_v18  ;;  %921 = vmatprep.subr.bf16.mxu1 %v995_v18  ;;  %v998_v23 = vld [vmem:[%s1178_s29 + $0x20] sm:$0xff]   ;;  %v1004_v27 = vld [vmem:[%s1185_s15 + $0x8] sm:$0xff]   ;;  %v1006_v29 = vld [vmem:[%s1185_s15 + $0x10] sm:$0xff]  }
  0x3d   : > { %904 = vmatprep.mubr.bf16.mxu0 %v1002_v21  ;;  %912 = vmatprep.mubr.bf16.mxu1 %v1003_v22  ;;  %v1005_v28 = vld [vmem:[%s1185_s15 + $0x28] sm:$0xff]   ;;  %v1007_v30 = vld [vmem:[%s1185_s15 + $0x30] sm:$0xff]   ;;  %v1008_v31 = vld [vmem:[%s1185_s15 + $0x18] sm:$0xff]  }
  0x3e   : > { %v1009_v32 = vld [vmem:[%s1185_s15 + $0x38] sm:$0xff]   ;;  %v363_v33 = vld [vmem:[%s1183_s7 + $0x10] sm:$0xff]  ;;  %v361_v35 = vld [vmem:[%s1183_s7] sm:$0xff] }
  0x3f   : > { %891 = vmatpush3.bf16.msra.mxu0 %v995_v18  ;;  %929 = vmatpush3.bf16.msra.mxu1 %v995_v18  ;;  %v371_v34 = vld [vmem:[%s1183_s7 + $0x50] sm:$0xff]  ;;  %v369_v36 = vld [vmem:[%s1183_s7 + $0x40] sm:$0xff]  ;;  %v364_v39 = vld [vmem:[%s1183_s7 + $0x18] sm:$0xff] }
  0x40   : > { %892 = vmatprep.subr.bf16.mxu0 %v996_v19  ;;  %922 = vmatprep.subr.bf16.mxu1 %v996_v19  ;;  %v372_v40 = vld [vmem:[%s1183_s7 + $0x58] sm:$0xff]  ;;  %v362_v45 = vld [vmem:[%s1183_s7 + $0x8] sm:$0xff]  ;;  %v367_v57 = vld [vmem:[%s1183_s7 + $0x30] sm:$0xff] }
  0x41   : > { %v370_v46 = vld [vmem:[%s1183_s7 + $0x48] sm:$0xff]  ;;  %v375_v58 = vld [vmem:[%s1183_s7 + $0x70] sm:$0xff]  ;;  %v365_v59 = vld [vmem:[%s1183_s7 + $0x20] sm:$0xff] }
  0x42   : > { %v373_v60 = vld [vmem:[%s1183_s7 + $0x60] sm:$0xff]  ;;  %v368_v63 = vld [vmem:[%s1183_s7 + $0x38] sm:$0xff]  ;;  %v366_v5 = vld [vmem:[%s1183_s7 + $0x28] sm:$0xff] }
  0x43   : > { %893 = vmatpush3.bf16.msra.mxu0 %v996_v19  ;;  %930 = vmatpush3.bf16.msra.mxu1 %v996_v19  ;;  %v376_v0 = vld [vmem:[%s1183_s7 + $0x78] sm:$0xff]  ;;  %v374_v6 = vld [vmem:[%s1183_s7 + $0x68] sm:$0xff]  ;;  %v1257_v18 = vld [vmem:[%s1351_s2] ss:$0 sm:$0xff] (!%p867_p13) }
  0x44   : > { %894 = vmatprep.subr.bf16.mxu0 %v997_v20  ;;  %923 = vmatprep.subr.bf16.mxu1 %v997_v20  ;;  %v1262_v19 = vld [vmem:[%s1352_s3] ss:$0 sm:$0xff] (!%p867_p13) }
  0x47   : > { %895 = vmatpush3.bf16.msra.mxu0 %v997_v20  ;;  %931 = vmatpush3.bf16.msra.mxu1 %v997_v20 }
  0x48   : > { %896 = vmatprep.subr.bf16.mxu0 %v998_v23  ;;  %924 = vmatprep.subr.bf16.mxu1 %v998_v23 }
  0x4b   : > { %897 = vmatpush3.bf16.msra.mxu0 %v998_v23  ;;  %932 = vmatpush3.bf16.msra.mxu1 %v998_v23 }
  0x4c   : > { %898 = vmatprep.subr.bf16.mxu0 %v999_v24  ;;  %925 = vmatprep.subr.bf16.mxu1 %v999_v24 }
  0x4f   : > { %899 = vmatpush3.bf16.msra.mxu0 %v999_v24  ;;  %933 = vmatpush3.bf16.msra.mxu1 %v999_v24 }
  0x50   : > { %900 = vmatprep.subr.bf16.mxu0 %v1000_v25  ;;  %926 = vmatprep.subr.bf16.mxu1 %v1000_v25 }
  0x53   : > { %901 = vmatpush3.bf16.msra.mxu0 %v1000_v25  ;;  %934 = vmatpush3.bf16.msra.mxu1 %v1000_v25 }
  0x54   : > { %902 = vmatprep.subr.bf16.mxu0 %v1001_v26  ;;  %927 = vmatprep.subr.bf16.mxu1 %v1001_v26 }
  0x57   : > { %903 = vmatpush3.bf16.msra.mxu0 %v1001_v26  ;;  %935 = vmatpush3.bf16.msra.mxu1 %v1001_v26 }
  0x5a   : > { %905 = vmatmul.mubr.bf16.vlgmr.msra.gmra.mrb[0].mxu0 %v1004_v27  ;;  %913 = vmatmul.mubr.bf16.vlgmr.msra.gmra.mrb[0].mxu1 %v1005_v28 }
  0x5b   : > { %908 = vmatprep.mubr.bf16.mxu0 %v1006_v29  ;;  %916 = vmatprep.mubr.bf16.mxu1 %v1007_v30 }
  0x62   : > { %909 = vmatmul.mubr.bf16.gmra.mrb[4].mxu0 %v1008_v31  ;;  %917 = vmatmul.mubr.bf16.gmra.mrb[4].mxu1 %v1009_v32 }
 0x12d   : > { %v906_v37 = vpop.f32.mrb[0].mxu0  ;;  %v914_v38 = vpop.f32.mrb[0].mxu1 }
 0x12e   : > { %v604_v41 = vadd.f32 %v906_v37, %v363_v33  ;;  %v612_v42 = vadd.f32 %v914_v38, %v371_v34  ;;  %v539_v43 = vpop.f32.mrb[1].mxu0  ;;  %v571_v44 = vpop.f32.mrb[1].mxu1 }
 0x12f   : > { %v602_v47 = vadd.f32 %v539_v43, %v361_v35  ;;  %v610_v48 = vadd.f32 %v571_v44, %v369_v36  ;;  %v907_v49 = vpop.f32.mrb[2].mxu0  ;;  %v915_v50 = vpop.f32.mrb[2].mxu1 }
 0x130   : > { %620 = vst [vmem:[%s1183_s7 + $0x10] sm:$0xff] %v604_v41  ;;  %628 = vst [vmem:[%s1183_s7 + $0x50] sm:$0xff] %v612_v42  ;;  %v605_v51 = vadd.f32 %v907_v49, %v364_v39  ;;  %v613_v52 = vadd.f32 %v915_v50, %v372_v40  ;;  %v542_v53 = vpop.f32.mrb[3].mxu0  ;;  %v574_v54 = vpop.f32.mrb[3].mxu1 }
 0x131   : > { %618 = vst [vmem:[%s1183_s7] sm:$0xff] %v602_v47  ;;  %626 = vst [vmem:[%s1183_s7 + $0x40] sm:$0xff] %v610_v48  ;;  %v603_v55 = vadd.f32 %v542_v53, %v362_v45  ;;  %v611_v56 = vadd.f32 %v574_v54, %v370_v46 }
 0x132   : > { %621 = vst [vmem:[%s1183_s7 + $0x18] sm:$0xff] %v605_v51  ;;  %629 = vst [vmem:[%s1183_s7 + $0x58] sm:$0xff] %v613_v52 }
 0x133   : > { %619 = vst [vmem:[%s1183_s7 + $0x8] sm:$0xff] %v603_v55  ;;  %627 = vst [vmem:[%s1183_s7 + $0x48] sm:$0xff] %v611_v56 }
 0x135   : > { %v910_v61 = vpop.f32.mrb[4].mxu0  ;;  %v918_v62 = vpop.f32.mrb[4].mxu1  ;;  %637 = sbr.rel (%p867_p13) target bundleno = 334 (0x14e), region = 85 }
 0x136   : > { %v608_v1 = vadd.f32 %v910_v61, %v367_v57  ;;  %v616_v2 = vadd.f32 %v918_v62, %v375_v58  ;;  %v555_v3 = vpop.f32.mrb[5].mxu0  ;;  %v587_v4 = vpop.f32.mrb[5].mxu1 }
 0x137   : > { %v606_v7 = vadd.f32 %v555_v3, %v365_v59  ;;  %v614_v8 = vadd.f32 %v587_v4, %v373_v60  ;;  %v911_v9 = vpop.f32.mrb[6].mxu0  ;;  %v919_v10 = vpop.f32.mrb[6].mxu1  ;;  %v640_v22 = vld [vmem:[%s1183_s7 + $0x10] sm:$0xff] (!%p867_p13) }
 0x138   : > { %624 = vst [vmem:[%s1183_s7 + $0x30] sm:$0xff] %v608_v1  ;;  %632 = vst [vmem:[%s1183_s7 + $0x70] sm:$0xff] %v616_v2  ;;  %v609_v11 = vadd.f32 %v911_v9, %v368_v63  ;;  %v617_v12 = vadd.f32 %v919_v10, %v376_v0  ;;  %v558_v13 = vpop.f32.mrb[7].mxu0  ;;  %v590_v14 = vpop.f32.mrb[7].mxu1  ;;  %v638_v17 = vld [vmem:[%s1183_s7] sm:$0xff] (!%p867_p13)  ;;  %v663_v25 = vadd.f32 (!%p867_p13), %v1257_v18, %v640_v22  ;;  %v648_v40 = vld [vmem:[%s1183_s7 + $0x50] sm:$0xff] (!%p867_p13) }
 0x139   : > { %622 = vst [vmem:[%s1183_s7 + $0x20] sm:$0xff] %v606_v7  ;;  %630 = vst [vmem:[%s1183_s7 + $0x60] sm:$0xff] %v614_v8  ;;  %v607_v15 = vadd.f32 %v558_v13, %v366_v5  ;;  %v615_v16 = vadd.f32 %v590_v14, %v374_v6  ;;  %v661_v20 = vadd.f32 (!%p867_p13), %v1257_v18, %v638_v17  ;;  %v641_v23 = vld [vmem:[%s1183_s7 + $0x18] sm:$0xff] (!%p867_p13)  ;;  %v646_v38 = vld [vmem:[%s1183_s7 + $0x40] sm:$0xff] (!%p867_p13) }
 0x13a   : > { %625 = vst [vmem:[%s1183_s7 + $0x38] sm:$0xff] %v609_v11  ;;  %633 = vst [vmem:[%s1183_s7 + $0x78] sm:$0xff] %v617_v12  ;;  %v639_v21 = vld [vmem:[%s1183_s7 + $0x8] sm:$0xff] (!%p867_p13)  ;;  %v664_v26 = vadd.f32 (!%p867_p13), %v1257_v18, %v641_v23  ;;  %vm679_vm2 = vcmp.gt.f32.partialorder (!%p867_p13), %v663_v25, 0.0  ;;  %v702_v33 = vmul.f32 (!%p867_p13), %v1262_v19, %v663_v25  ;;  %v669_v49 = vadd.f32 (!%p867_p13), %v1257_v18, %v646_v38  ;;  %v649_v54 = vld [vmem:[%s1183_s7 + $0x58] sm:$0xff] (!%p867_p13) }
 0x13b   : > { %623 = vst [vmem:[%s1183_s7 + $0x28] sm:$0xff] %v607_v15  ;;  %631 = vst [vmem:[%s1183_s7 + $0x68] sm:$0xff] %v615_v16  ;;  %v662_v24 = vadd.f32 (!%p867_p13), %v1257_v18, %v639_v21  ;;  %vm677_vm0 = vcmp.gt.f32.partialorder (!%p867_p13), %v661_v20, 0.0  ;;  %v700_v29 = vmul.f32 (!%p867_p13), %v1262_v19, %v661_v20  ;;  %v647_v39 = vld [vmem:[%s1183_s7 + $0x48] sm:$0xff] (!%p867_p13)  ;;  %v671_v51 = vadd.f32 (!%p867_p13), %v1257_v18, %v648_v40 }
 0x13c   : > { %vm680_vm3 = vcmp.gt.f32.partialorder %v664_v26, 0.0  ;;  %v703_v37 = vmul.f32 %v1262_v19, %v664_v26  ;;  %v718_v42 = vsel %vm679_vm2, %v663_v25, %v702_v33  ;;  %v670_v50 = vadd.f32 %v1257_v18, %v647_v39 }
 0x13d   : > { %vm678_vm1 = vcmp.gt.f32.partialorder %v662_v24, 0.0  ;;  %v701_v32 = vmul.f32 %v1262_v19, %v662_v24  ;;  %v716_v36 = vsel %vm677_vm0, %v661_v20, %v700_v29  ;;  %734 = vst [vmem:[%s1183_s7 + $0x10] sm:$0xff] %v718_v42  ;;  %vm685_vm8 = vcmp.gt.f32.partialorder %v669_v49, 0.0 }
 0x13e   : > { %732 = vst [vmem:[%s1183_s7] sm:$0xff] %v716_v36  ;;  %v719_v44 = vsel %vm680_vm3, %v664_v26, %v703_v37  ;;  %v708_v57 = vmul.f32 %v1262_v19, %v669_v49  ;;  %vm686_vm9 = vcmp.gt.f32.partialorder %v670_v50, 0.0  ;;  %v709_v61 = vmul.f32 %v1262_v19, %v670_v50 }
 0x13f   : > { %v644_v34 = vld [vmem:[%s1183_s7 + $0x30] sm:$0xff]  ;;  %v717_v41 = vsel %vm678_vm1, %v662_v24, %v701_v32  ;;  %735 = vst [vmem:[%s1183_s7 + $0x18] sm:$0xff] %v719_v44  ;;  %vm687_vm10 = vcmp.gt.f32.partialorder %v671_v51, 0.0  ;;  %v710_v62 = vmul.f32 %v1262_v19, %v671_v51  ;;  %v672_v1 = vadd.f32 %v1257_v18, %v649_v54 }
 0x140   : > { %v642_v27 = vld [vmem:[%s1183_s7 + $0x20] sm:$0xff]  ;;  %733 = vst [vmem:[%s1183_s7 + $0x8] sm:$0xff] %v717_v41  ;;  %v667_v46 = vadd.f32 %v1257_v18, %v644_v34  ;;  %v652_v59 = vld [vmem:[%s1183_s7 + $0x70] sm:$0xff]  ;;  %v724_v0 = vsel %vm685_vm8, %v669_v49, %v708_v57  ;;  %v725_v3 = vsel %vm686_vm9, %v670_v50, %v709_v61 }
 0x141   : > { %v665_v30 = vadd.f32 %v1257_v18, %v642_v27  ;;  %v645_v35 = vld [vmem:[%s1183_s7 + $0x38] sm:$0xff]  ;;  %v650_v55 = vld [vmem:[%s1183_s7 + $0x60] sm:$0xff]  ;;  %740 = vst [vmem:[%s1183_s7 + $0x40] sm:$0xff] %v724_v0  ;;  %v726_v4 = vsel %vm687_vm10, %v671_v51, %v710_v62  ;;  %v675_v6 = vadd.f32 %v1257_v18, %v652_v59  ;;  %741 = vst [vmem:[%s1183_s7 + $0x48] sm:$0xff] %v725_v3  ;;  %vm688_vm11 = vcmp.gt.f32.partialorder %v672_v1, 0.0 }
 0x142   : > { %v643_v28 = vld [vmem:[%s1183_s7 + $0x28] sm:$0xff]  ;;  %v668_v47 = vadd.f32 %v1257_v18, %v645_v35  ;;  %vm683_vm6 = vcmp.gt.f32.partialorder %v667_v46, 0.0  ;;  %v706_v53 = vmul.f32 %v1262_v19, %v667_v46  ;;  %v673_v2 = vadd.f32 %v1257_v18, %v650_v55  ;;  %v653_v7 = vld [vmem:[%s1183_s7 + $0x78] sm:$0xff]  ;;  %742 = vst [vmem:[%s1183_s7 + $0x50] sm:$0xff] %v726_v4 }
 0x143   : > { %v666_v31 = vadd.f32 %v1257_v18, %v643_v28  ;;  %vm681_vm4 = vcmp.gt.f32.partialorder %v665_v30, 0.0  ;;  %v704_v43 = vmul.f32 %v1262_v19, %v665_v30  ;;  %v651_v58 = vld [vmem:[%s1183_s7 + $0x68] sm:$0xff]  ;;  %v711_v8 = vmul.f32 %v1262_v19, %v672_v1 }
 0x144   : > { %vm684_vm7 = vcmp.gt.f32.partialorder %v668_v47, 0.0  ;;  %v707_v56 = vmul.f32 %v1262_v19, %v668_v47  ;;  %v722_v60 = vsel %vm683_vm6, %v667_v46, %v706_v53  ;;  %v674_v5 = vadd.f32 %v1257_v18, %v651_v58 }
 0x145   : > { %vm682_vm5 = vcmp.gt.f32.partialorder %v666_v31, 0.0  ;;  %v705_v45 = vmul.f32 %v1262_v19, %v666_v31  ;;  %v720_v48 = vsel %vm681_vm4, %v665_v30, %v704_v43  ;;  %738 = vst [vmem:[%s1183_s7 + $0x30] sm:$0xff] %v722_v60  ;;  %vm689_vm12 = vcmp.gt.f32.partialorder %v673_v2, 0.0 }
 0x146   : > { %736 = vst [vmem:[%s1183_s7 + $0x20] sm:$0xff] %v720_v48  ;;  %v723_v63 = vsel %vm684_vm7, %v668_v47, %v707_v56  ;;  %v712_v9 = vmul.f32 %v1262_v19, %v673_v2  ;;  %vm690_vm13 = vcmp.gt.f32.partialorder %v674_v5, 0.0  ;;  %v713_v10 = vmul.f32 %v1262_v19, %v674_v5 }
 0x147   : > { %v721_v52 = vsel %vm682_vm5, %v666_v31, %v705_v45  ;;  %739 = vst [vmem:[%s1183_s7 + $0x38] sm:$0xff] %v723_v63  ;;  %vm691_vm14 = vcmp.gt.f32.partialorder %v675_v6, 0.0  ;;  %v714_v11 = vmul.f32 %v1262_v19, %v675_v6  ;;  %v727_v12 = vsel %vm688_vm11, %v672_v1, %v711_v8 }
 0x148   : > { %737 = vst [vmem:[%s1183_s7 + $0x28] sm:$0xff] %v721_v52  ;;  %v728_v13 = vsel %vm689_vm12, %v673_v2, %v712_v9  ;;  %v676_v14 = vadd.f32 %v1257_v18, %v653_v7  ;;  %743 = vst [vmem:[%s1183_s7 + $0x58] sm:$0xff] %v727_v12  ;;  %v729_v15 = vsel %vm690_vm13, %v674_v5, %v713_v10 }
 0x149   : > { %744 = vst [vmem:[%s1183_s7 + $0x60] sm:$0xff] %v728_v13  ;;  %v730_v16 = vsel %vm691_vm14, %v675_v6, %v714_v11  ;;  %745 = vst [vmem:[%s1183_s7 + $0x68] sm:$0xff] %v729_v15 }
 0x14a   : > { %746 = vst [vmem:[%s1183_s7 + $0x70] sm:$0xff] %v730_v16  ;;  %vm692_vm15 = vcmp.gt.f32.partialorder %v676_v14, 0.0  ;;  %v715_v17 = vmul.f32 %v1262_v19, %v676_v14 }
 0x14c   : > { %v731_v20 = vsel %vm692_vm15, %v676_v14, %v715_v17 }
 0x14d   : > { %747 = vst [vmem:[%s1183_s7 + $0x78] sm:$0xff] %v731_v20 }
 0x14e PF: > { %s14_s21 = sadd.s32 1, %s1064_s21   ;;  %s1354_s15 = smov %s1044_s16 }
 0x14f   : > { %p11_p0 = scmp.ge.s32.totalorder %s14_s21, 11   ;;  %s1355_s16 = smov %s1143_s28 }
 0x150   : > { %s1356_s17 = smov %s1056_s19  ;;  %s1357_s18 = smov %s1060_s20 }
 0x151   : > { %s1358_s19 = smov %s1361_s22  ;;  %s1359_s20 = smov %s1365_s23 }
 0x152   :  { %13 = sbr.rel (!%p11_p0) target bundleno = 4 (0x4), region = 123 }

</bundles_post_ra>
